<compile_context>
chip_gen: v5e
topology: v5e:2x2
jax: 0.10.0
libtpu: 0.0.40
codegen_flags: <defaults>
</compile_context>

<pallas_src>
import math

import jax
import jax.numpy as jnp
from jax.experimental import pallas as pl
from jax.experimental.pallas import tpu as pltpu

_LANE = 128
_SUBLANE = 8
_TARGET_TILE = 4096  # rows per batch tile at large B (multiple of 8, ~7 MiB working set)


def _round_up(x, m):
    return ((x + m - 1) // m) * m


def _qnet_kernel(x_ref, w1_ref, b1_ref, w2_ref, b2_ref, w3_ref, b3_ref, o_ref):
    """Fused forward for one batch tile: LReLU(LReLU(LReLU(x@W1+b1)@W2+b2)@W3+b3)."""
    slope = 0.01

    def lrelu(v):  # elementwise in f32 (accumulator dtype) — v5e has no bf16 VPU path
        return jnp.where(v > 0, v, slope * v)

    cdt = w1_ref.dtype                       # compute dtype (bf16) — MXU-native operands
    x = x_ref[...].astype(cdt)               # in-kernel cast; x arrives in f32, unpadded
    h = jnp.dot(x, w1_ref[...], preferred_element_type=jnp.float32) + b1_ref[...]
    h = lrelu(h).astype(cdt)
    h = jnp.dot(h, w2_ref[...], preferred_element_type=jnp.float32) + b2_ref[...]
    h = lrelu(h).astype(cdt)
    h = jnp.dot(h, w3_ref[...], preferred_element_type=jnp.float32) + b3_ref[...]
    o_ref[...] = lrelu(h).astype(o_ref.dtype)


def prepare_qnet_params(params, compute_dtype=jnp.bfloat16):
    """One-time cast of the parameters to the kernel's layout/dtypes.

    Call this ONCE (outside the per-forward hot path) so no astype/pad ops run per call.
    Weights -> compute_dtype (bf16, MXU-native), [in, out] layout; biases -> f32 rows [1, out].
    """
    return {
        "w1": params["w1"].astype(compute_dtype),
        "w2": params["w2"].astype(compute_dtype),
        "w3": params["w3"].astype(compute_dtype),
        "b1": params["b1"].astype(jnp.float32).reshape(1, -1),
        "b2": params["b2"].astype(jnp.float32).reshape(1, -1),
        "b3": params["b3"].astype(jnp.float32).reshape(1, -1),
    }


def qnet_forward(x, prepared, *, block_b=None, out_dtype=jnp.float32, x_buffers=None):
    """x: [B, input_size] float32.  prepared: output of prepare_qnet_params()."""
    B, in_dim = x.shape
    hid = prepared["w1"].shape[1]
    out_dim = prepared["w3"].shape[1]
    assert prepared["w1"].shape[0] == in_dim, "w1 must be [input_size, 128] (transposed layout)"

    # ---- batch tiling -------------------------------------------------------
    # Large tiles amortize the ~0.35us/step overhead; still force >=2 tiles whenever B allows two
    # >=8-row tiles so ("parallel",) sharding can use both v7x TensorCores.
    if block_b is None:
        if B < 2 * _SUBLANE:
            block_b = B                                                  # too small to split
        else:
            block_b = min(_TARGET_TILE, _round_up(pl.cdiv(B, 2), _SUBLANE))
    elif block_b >= B:
        block_b = B
    else:
        block_b = max(_SUBLANE, (block_b // _SUBLANE) * _SUBLANE)       # respect (8,128) rule
    grid_steps = pl.cdiv(B, block_b)
    grid = (grid_steps,)

    # ---- VMEM budget / scheduler cost hint ----------------------------------
    cdt_bytes = jnp.dtype(prepared["w1"].dtype).itemsize
    x_bytes = jnp.dtype(x.dtype).itemsize
    out_bytes = jnp.dtype(out_dtype).itemsize
    footprint = (
        2 * block_b * in_dim * x_bytes                                  # x tile, double-buffered
        + 2 * block_b * out_dim * out_bytes                             # out tile, double-buffered
        + (in_dim * hid + hid * hid + hid * out_dim) * cdt_bytes        # resident weights
        + (2 * hid + out_dim) * 4                                       # resident biases
        + 3 * block_b * hid * 4                                         # f32/bf16 intermediates
    )
    # ~2x working set, small floor; never anywhere near v7x's 64 MiB physical VMEM per TC.
    vmem_limit = int(min(max(2 * footprint, 4 * 1024 * 1024), 32 * 1024 * 1024))

    cost = pl.CostEstimate(
        flops=2 * B * (in_dim * hid + hid * hid + hid * out_dim),
        transcendentals=0,
        bytes_accessed=(
            B * in_dim * x_bytes
            + (in_dim * hid + hid * hid + hid * out_dim) * cdt_bytes
            + (2 * hid + out_dim) * 4
            + B * out_dim * out_bytes
        ),
    )

    # x is the only pipelined operand; optional triple-buffering (sweepable) once the grid is deep.
    if x_buffers is not None and grid_steps >= x_buffers:
        x_spec = pl.BlockSpec((block_b, in_dim), lambda i: (i, 0),
                              pipeline_mode=pl.Buffered(x_buffers))
    else:
        x_spec = pl.BlockSpec((block_b, in_dim), lambda i: (i, 0))

    # Grid-invariant parameters: whole tensor resident in VMEM (no double-buffering).
    vmem_resident = pl.BlockSpec(memory_space=pltpu.MemorySpace.VMEM)

    return pl.pallas_call(
        _qnet_kernel,
        out_shape=jax.ShapeDtypeStruct((B, out_dim), out_dtype),
        grid_spec=pltpu.PrefetchScalarGridSpec(
            num_scalar_prefetch=0,
            grid=grid,
            in_specs=[
                x_spec,          # x tile (pipelined)
                vmem_resident,   # w1
                vmem_resident,   # b1
                vmem_resident,   # w2
                vmem_resident,   # b2
                vmem_resident,   # w3
                vmem_resident,   # b3
            ],
            out_specs=pl.BlockSpec((block_b, out_dim), lambda i: (i, 0)),
        ),
        compiler_params=pltpu.CompilerParams(
            dimension_semantics=("parallel",),
            vmem_limit_bytes=vmem_limit,
        ),
        cost_estimate=cost,
    )(x, prepared["w1"], prepared["b1"], prepared["w2"], prepared["b2"],
      prepared["w3"], prepared["b3"])


def init_qnet_params(key, input_size, output_size, hidden=128):
    """Deterministic init mirroring the PyTorch module:
       - weights: xavier_uniform with gain = calculate_gain('leaky_relu') = sqrt(2/(1+0.01^2))
       - biases: default nn.Linear init, uniform(-1/sqrt(fan_in), 1/sqrt(fan_in))
       Weights are produced directly in [in, out] (transposed) layout."""
    gain = math.sqrt(2.0 / (1.0 + 0.01 ** 2))
    keys = jax.random.split(key, 6)

    def xavier(k, fan_in, fan_out):
        limit = gain * math.sqrt(6.0 / (fan_in + fan_out))
        return jax.random.uniform(k, (fan_in, fan_out), jnp.float32, -limit, limit)

    def bias(k, fan_in, fan_out):
        bound = 1.0 / math.sqrt(fan_in)
        return jax.random.uniform(k, (1, fan_out), jnp.float32, -bound, bound)

    return {
        "w1": xavier(keys[0], input_size, hidden),
        "b1": bias(keys[1], input_size, hidden),
        "w2": xavier(keys[2], hidden, hidden),
        "b2": bias(keys[3], hidden, hidden),
        "w3": xavier(keys[4], hidden, output_size),
        "b3": bias(keys[5], hidden, output_size),
    }


def _reference_forward(x, prepared):
    """Same precision recipe as the kernel: bf16 operands, f32 accumulation, f32 LReLU."""
    def lrelu(v):
        return jnp.where(v > 0, v, 0.01 * v)

    cdt = prepared["w1"].dtype
    h = jnp.dot(x.astype(cdt), prepared["w1"], preferred_element_type=jnp.float32) + prepared["b1"]
    h = lrelu(h).astype(cdt)
    h = jnp.dot(h, prepared["w2"], preferred_element_type=jnp.float32) + prepared["b2"]
    h = lrelu(h).astype(cdt)
    h = jnp.dot(h, prepared["w3"], preferred_element_type=jnp.float32) + prepared["b3"]
    return lrelu(h)


if __name__ == "__main__":
    key = jax.random.PRNGKey(0)
    k_x, k_x2, k_p = jax.random.split(key, 3)

    input_size = 32
    output_size = 8

    params = init_qnet_params(k_p, input_size, output_size)
    prepared = prepare_qnet_params(params)   # one-time cast; reused by every forward call

    # ---- small batch (single tile) ----------------------------------------
    batch = 8
    x = jax.random.normal(k_x, (batch, input_size), jnp.float32)
    out = jax.block_until_ready(qnet_forward(x, prepared))
    ref = _reference_forward(x, prepared)
    assert out.shape == (batch, output_size)
    assert out.dtype == jnp.float32
    assert jnp.allclose(out, ref, atol=1e-2, rtol=1e-2), "mismatch vs JAX reference (small batch)"

    # ---- larger batch: exercises the multi-tile grid (2 parallel tiles) and
    # a non-divisible final block (Pallas clips out-of-range output rows).
    batch2 = 2056
    x2 = jax.random.normal(k_x2, (batch2, input_size), jnp.float32)
    out2 = jax.block_until_ready(qnet_forward(x2, prepared))
    ref2 = _reference_forward(x2, prepared)
    assert out2.shape == (batch2, output_size)
    assert jnp.allclose(out2, ref2, atol=1e-2, rtol=1e-2), "mismatch vs JAX reference (tiled batch)"

    print("KERNEL_OK")
</pallas_src>

<mosaic_0001>
module attributes {stable_mosaic.version = 11 : i64} {
  func.func @_qnet_kernel(%arg0: i32, %arg1: memref<8x32xf32, #tpu.memory_space<vmem>>, %arg2: memref<32x128xbf16, #tpu.memory_space<vmem>>, %arg3: memref<1x128xf32, #tpu.memory_space<vmem>>, %arg4: memref<128x128xbf16, #tpu.memory_space<vmem>>, %arg5: memref<1x128xf32, #tpu.memory_space<vmem>>, %arg6: memref<128x8xbf16, #tpu.memory_space<vmem>>, %arg7: memref<1x8xf32, #tpu.memory_space<vmem>>, %arg8: memref<8x8xf32, #tpu.memory_space<vmem>>) attributes {dimension_semantics = [#tpu.dimension_semantics<parallel>], iteration_bounds = array<i64: 1>, scalar_prefetch = 0 : i64, scratch_operands = 0 : i64, tpu.core_type = #tpu.core_type<tc>, window_params = [{transform_indices = @transform_0, window_bounds = array<i64: 8, 32>}, {pipeline_mode = #tpu.pipeline_mode<synchronous>, transform_indices = @transform_1, window_bounds = array<i64: 32, 128>}, {pipeline_mode = #tpu.pipeline_mode<synchronous>, transform_indices = @transform_2, window_bounds = array<i64: 1, 128>}, {pipeline_mode = #tpu.pipeline_mode<synchronous>, transform_indices = @transform_3, window_bounds = array<i64: 128, 128>}, {pipeline_mode = #tpu.pipeline_mode<synchronous>, transform_indices = @transform_4, window_bounds = array<i64: 1, 128>}, {pipeline_mode = #tpu.pipeline_mode<synchronous>, transform_indices = @transform_5, window_bounds = array<i64: 128, 8>}, {pipeline_mode = #tpu.pipeline_mode<synchronous>, transform_indices = @transform_6, window_bounds = array<i64: 1, 8>}, {transform_indices = @transform_7, window_bounds = array<i64: 8, 8>}]} {
    %c0 = arith.constant 0 : index
    %c0_0 = arith.constant 0 : index
    %0 = vector.load %arg1[%c0, %c0_0] : memref<8x32xf32, #tpu.memory_space<vmem>>, vector<8x32xf32>
    %1 = arith.truncf %0 : vector<8x32xf32> to vector<8x32xbf16>
    %c0_1 = arith.constant 0 : index
    %c0_2 = arith.constant 0 : index
    %2 = vector.load %arg2[%c0_1, %c0_2] : memref<32x128xbf16, #tpu.memory_space<vmem>>, vector<32x128xbf16>
    %cst = arith.constant dense<0.000000e+00> : vector<8x128xf32>
    %3 = tpu.matmul %1, %2, %cst {dimension_numbers = #tpu.dot_dimension_numbers<[1], [0], [0], [1], [0, 0, 1, 1], [], []>} : vector<8x32xbf16>, vector<32x128xbf16>, vector<8x128xf32> -> vector<8x128xf32>
    %c0_3 = arith.constant 0 : index
    %c0_4 = arith.constant 0 : index
    %4 = vector.load %arg3[%c0_3, %c0_4] : memref<1x128xf32, #tpu.memory_space<vmem>>, vector<1x128xf32>
    %5 = vector.broadcast %4 : vector<1x128xf32> to vector<8x128xf32>
    %6 = arith.addf %3, %5 : vector<8x128xf32>
    %cst_5 = arith.constant 0.000000e+00 : f32
    %7 = vector.broadcast %cst_5 : f32 to vector<8x128xf32>
    %8 = arith.cmpf ogt, %6, %7 : vector<8x128xf32>
    %cst_6 = arith.constant 0.00999999977 : f32
    %9 = vector.broadcast %cst_6 : f32 to vector<8x128xf32>
    %10 = arith.mulf %9, %6 : vector<8x128xf32>
    %11 = arith.select %8, %6, %10 : vector<8x128xi1>, vector<8x128xf32>
    %12 = arith.truncf %11 : vector<8x128xf32> to vector<8x128xbf16>
    %c0_7 = arith.constant 0 : index
    %c0_8 = arith.constant 0 : index
    %13 = vector.load %arg4[%c0_7, %c0_8] : memref<128x128xbf16, #tpu.memory_space<vmem>>, vector<128x128xbf16>
    %cst_9 = arith.constant dense<0.000000e+00> : vector<8x128xf32>
    %14 = tpu.matmul %12, %13, %cst_9 {dimension_numbers = #tpu.dot_dimension_numbers<[1], [0], [0], [1], [0, 0, 1, 1], [], []>} : vector<8x128xbf16>, vector<128x128xbf16>, vector<8x128xf32> -> vector<8x128xf32>
    %c0_10 = arith.constant 0 : index
    %c0_11 = arith.constant 0 : index
    %15 = vector.load %arg5[%c0_10, %c0_11] : memref<1x128xf32, #tpu.memory_space<vmem>>, vector<1x128xf32>
    %16 = vector.broadcast %15 : vector<1x128xf32> to vector<8x128xf32>
    %17 = arith.addf %14, %16 : vector<8x128xf32>
    %cst_12 = arith.constant 0.000000e+00 : f32
    %18 = vector.broadcast %cst_12 : f32 to vector<8x128xf32>
    %19 = arith.cmpf ogt, %17, %18 : vector<8x128xf32>
    %cst_13 = arith.constant 0.00999999977 : f32
    %20 = vector.broadcast %cst_13 : f32 to vector<8x128xf32>
    %21 = arith.mulf %20, %17 : vector<8x128xf32>
    %22 = arith.select %19, %17, %21 : vector<8x128xi1>, vector<8x128xf32>
    %23 = arith.truncf %22 : vector<8x128xf32> to vector<8x128xbf16>
    %c0_14 = arith.constant 0 : index
    %c0_15 = arith.constant 0 : index
    %24 = vector.load %arg6[%c0_14, %c0_15] : memref<128x8xbf16, #tpu.memory_space<vmem>>, vector<128x8xbf16>
    %cst_16 = arith.constant dense<0.000000e+00> : vector<8x8xf32>
    %25 = tpu.matmul %23, %24, %cst_16 {dimension_numbers = #tpu.dot_dimension_numbers<[1], [0], [0], [1], [0, 0, 1, 1], [], []>} : vector<8x128xbf16>, vector<128x8xbf16>, vector<8x8xf32> -> vector<8x8xf32>
    %c0_17 = arith.constant 0 : index
    %c0_18 = arith.constant 0 : index
    %26 = vector.load %arg7[%c0_17, %c0_18] : memref<1x8xf32, #tpu.memory_space<vmem>>, vector<1x8xf32>
    %27 = vector.broadcast %26 : vector<1x8xf32> to vector<8x8xf32>
    %28 = arith.addf %25, %27 : vector<8x8xf32>
    %cst_19 = arith.constant 0.000000e+00 : f32
    %29 = vector.broadcast %cst_19 : f32 to vector<8x8xf32>
    %30 = arith.cmpf ogt, %28, %29 : vector<8x8xf32>
    %cst_20 = arith.constant 0.00999999977 : f32
    %31 = vector.broadcast %cst_20 : f32 to vector<8x8xf32>
    %32 = arith.mulf %31, %28 : vector<8x8xf32>
    %33 = arith.select %30, %28, %32 : vector<8x8xi1>, vector<8x8xf32>
    %c0_21 = arith.constant 0 : index
    %c0_22 = arith.constant 0 : index
    %34 = vector.load %arg8[%c0_21, %c0_22] : memref<8x8xf32, #tpu.memory_space<vmem>>, vector<8x8xf32>
    tpu.vector_store %arg8[%c0_21, %c0_22], %33 {strides = array<i32>} : memref<8x8xf32, #tpu.memory_space<vmem>>, vector<8x8xf32>,
    return
  }
  func.func @transform_0(%arg0: i32) -> (i32, i32) {
    %c0_i32 = arith.constant 0 : i32
    %c0_i32_0 = arith.constant 0 : i32
    return %arg0, %c0_i32 : i32, i32
  }
  func.func @transform_1(%arg0: i32) -> (i32, i32) {
    %c0_i32 = arith.constant 0 : i32
    %c0_i32_0 = arith.constant 0 : i32
    %c0_i32_1 = arith.constant 0 : i32
    return %c0_i32, %c0_i32_0 : i32, i32
  }
  func.func @transform_2(%arg0: i32) -> (i32, i32) {
    %c0_i32 = arith.constant 0 : i32
    %c0_i32_0 = arith.constant 0 : i32
    %c0_i32_1 = arith.constant 0 : i32
    return %c0_i32, %c0_i32_0 : i32, i32
  }
  func.func @transform_3(%arg0: i32) -> (i32, i32) {
    %c0_i32 = arith.constant 0 : i32
    %c0_i32_0 = arith.constant 0 : i32
    %c0_i32_1 = arith.constant 0 : i32
    return %c0_i32, %c0_i32_0 : i32, i32
  }
  func.func @transform_4(%arg0: i32) -> (i32, i32) {
    %c0_i32 = arith.constant 0 : i32
    %c0_i32_0 = arith.constant 0 : i32
    %c0_i32_1 = arith.constant 0 : i32
    return %c0_i32, %c0_i32_0 : i32, i32
  }
  func.func @transform_5(%arg0: i32) -> (i32, i32) {
    %c0_i32 = arith.constant 0 : i32
    %c0_i32_0 = arith.constant 0 : i32
    %c0_i32_1 = arith.constant 0 : i32
    return %c0_i32, %c0_i32_0 : i32, i32
  }
  func.func @transform_6(%arg0: i32) -> (i32, i32) {
    %c0_i32 = arith.constant 0 : i32
    %c0_i32_0 = arith.constant 0 : i32
    %c0_i32_1 = arith.constant 0 : i32
    return %c0_i32, %c0_i32_0 : i32, i32
  }
  func.func @transform_7(%arg0: i32) -> (i32, i32) {
    %c0_i32 = arith.constant 0 : i32
    %c0_i32_0 = arith.constant 0 : i32
    return %arg0, %c0_i32 : i32, i32
  }
}

</mosaic_0001>

<bundles_post_ra>
// kernel: tpu_custom_call.1
= control target key start
LH: loop header
LB: loop body
LE: loop exit
PB: predicated region body
PF: predicated region fallthrough
CT: control target
= control target key end

     0   :  { %12 = vsyncpa [#allocation3], 0  ;;  %s578_s0 = inlined_call_operand.hbm [shape: f32[8,32], index: 0, kind: input, shape index: {}]   ;;  %s579_s1 = inlined_call_operand.hbm [shape: bf16[32,128], index: 1, kind: input, shape index: {}]   ;;  %s580_s2 = inlined_call_operand.vmem [shape: f32[1,128], index: 2, kind: input, shape index: {}]   ;;  %s581_s3 = inlined_call_operand.vmem [shape: bf16[128,128], index: 3, kind: input, shape index: {}]   ;;  %s582_s4 = inlined_call_operand.vmem [shape: f32[1,128], index: 4, kind: input, shape index: {}]   ;;  %s583_s5 = inlined_call_operand.vmem [shape: bf16[128,8], index: 5, kind: input, shape index: {}]   ;;  %s584_s6 = inlined_call_operand.vmem [shape: f32[1,8], index: 6, kind: input, shape index: {}]   ;;  %s585_s7 = inlined_call_operand.hbm [shape: f32[8,8], index: 7, kind: output, shape index: {}]  }
   0x1   :  { %13 = vsyncpa [#allocation6], 0 }
   0x2   :  { %14 = vsyncpa [#allocation4], 0  ;;  %s20_s26 = sshll.u32 %s578_s0, 4  ;;  %s467_s27 = smov [#allocation2]   ;;  %s21_s26 = int_to_ptr.hbm [resolvable:$true] %s20_s26 }
   0x3   :  { %s22_s28 = sshll.u32 %s467_s27, 4  ;;  %s30_s8 = sshll.u32 %s579_s1, 4  ;;  %s23_s28 = int_to_ptr.vmem [resolvable:$true] %s22_s28  ;;  %s31_s8 = int_to_ptr.hbm [resolvable:$true] %s30_s8 }
   0x4   :  { %25 = dma.hbm_to_vmem [thread:$0]  %s21_s26, 128, %s23_s28, [#allocation3]  }
   0x5   :  { %s468_s9 = smov [#allocation5]   ;;  %s469_s11 = smov 64  }
   0x6   :  { %s32_s10 = sshll.u32 %s468_s9, 4  ;;  %s470_s12 = smov 4   ;;  %s33_s10 = int_to_ptr.vmem [resolvable:$true] %s32_s10 }
   0x7   :  { %38 = dma.hbm_to_vmem [thread:$0]  %s31_s8, 256, %s33_s10, [#allocation6], %s469_s11, %s469_s11, %s470_s12  }
   0x8   :  { %461 = dma.done.wait [#allocation3], 128  }
   0x9   :  { %462 = vsyncadd [#allocation3], 4294967168 }
   0xa   :  { %463 = dma.done.wait [#allocation6], 256  }
   0xb   :  { %464 = vsyncadd [#allocation6], 4294967040  ;;  %v364_v0 = vld [vmem:[#allocation5 + $0x8] sm:$0xff]  ;;  %v372_v1 = vld [vmem:[%s581_s3 + $0x38] sm:$0xff]  ;;  %vm80_vm0 = vcmask 261120   ;;  %vm270_vm4 = vcmask 64512  }
   0xc   :  { %90 = vmatpush.bf16.msra.mxu0 %v364_v0  ;;  %v363_v2 = vld [vmem:[#allocation5] sm:$0xff]  ;;  %v58_v3 = vld [vmem:[#allocation2] sm:$0xff]  ;;  %169 = vmatpush.bf16.msra.mxu1 %v372_v1  ;;  %v371_v4 = vld [vmem:[%s581_s3 + $0x30] sm:$0xff] }
   0xd   :  { %v59_v5 = vpack.c.bf16 %v58_v3, %v58_v3  ;;  %v370_v6 = vld [vmem:[%s581_s3 + $0x28] sm:$0xff]  ;;  %v369_v7 = vld [vmem:[%s581_s3 + $0x20] sm:$0xff]  ;;  %v368_v8 = vld [vmem:[%s581_s3 + $0x18] sm:$0xff] }
   0xe   :  { %v367_v9 = vld [vmem:[%s581_s3 + $0x10] sm:$0xff]  ;;  %v366_v10 = vld [vmem:[%s581_s3 + $0x8] sm:$0xff]  ;;  %v365_v11 = vld [vmem:[%s581_s3] sm:$0xff] }
   0xf   :  { %v380_v12 = vld [vmem:[%s583_s5 + $0x38] sm:$0xff]  ;;  %v379_v13 = vld [vmem:[%s583_s5 + $0x30] sm:$0xff]  ;;  %v378_v14 = vld [vmem:[%s583_s5 + $0x28] sm:$0xff] }
  0x10   :  { %91 = vmatpush.bf16.msra.mxu0 %v363_v2  ;;  %170 = vmatpush.bf16.msra.mxu1 %v371_v4  ;;  %v377_v15 = vld [vmem:[%s583_s5 + $0x20] sm:$0xff]  ;;  %v376_v16 = vld [vmem:[%s583_s5 + $0x18] sm:$0xff]  ;;  %v375_v17 = vld [vmem:[%s583_s5 + $0x10] sm:$0xff] }
  0x11   :  { %254 = vmatpush.bf16.msra.mxu2 %v380_v12  ;;  %v386_v18 = vld [vmem:[%s580_s2] ss:$0 sm:$0xff]  ;;  %v374_v25 = vld [vmem:[%s583_s5 + $0x8] sm:$0xff] }
  0x12   :  { %v373_v26 = vld [vmem:[%s583_s5] sm:$0xff]  ;;  %s471_s5 = smov [#allocation7]  }
  0x13   :  { %298 = vmatmul.msk.bf16.vlgmr.msra.gmra.mxu0 %vm80_vm0, %v59_v5  ;;  %v387_v27 = vld [vmem:[%s582_s4] ss:$0 sm:$0xff]  ;;  %s277_s22 = sshll.u32 %s471_s5, 4  ;;  %s279_s4 = sshll.u32 %s585_s7, 4  ;;  %s278_s22 = int_to_ptr.vmem [resolvable:$true] %s277_s22  ;;  %s280_s4 = int_to_ptr.hbm [resolvable:$true] %s279_s4 }
  0x14   :  { %171 = vmatpush.bf16.msra.mxu1 %v370_v6  ;;  %v388_v34 = vld [vmem:[%s584_s6] ss:$0 sm:$0xff] }
  0x15   :  { %255 = vmatpush.bf16.msra.mxu2 %v379_v13 }
  0x18   :  { %172 = vmatpush.bf16.msra.mxu1 %v369_v7 }
  0x19   :  { %256 = vmatpush.bf16.msra.mxu2 %v378_v14 }
  0x1c   :  { %173 = vmatpush.bf16.msra.mxu1 %v368_v8 }
  0x1d   :  { %257 = vmatpush.bf16.msra.mxu2 %v377_v15 }
  0x20   :  { %174 = vmatpush.bf16.msra.mxu1 %v367_v9 }
  0x21   :  { %258 = vmatpush.bf16.msra.mxu2 %v376_v16 }
  0x24   :  { %175 = vmatpush.bf16.msra.mxu1 %v366_v10 }
  0x25   :  { %259 = vmatpush.bf16.msra.mxu2 %v375_v17 }
  0x28   :  { %176 = vmatpush.bf16.msra.mxu1 %v365_v11 }
  0x29   :  { %260 = vmatpush.bf16.msra.mxu2 %v374_v25 }
  0x2d   :  { %261 = vmatpush.bf16.msra.mxu2 %v373_v26 }
  0x90   :  { %v93_v19 = vpop.f32.mrf.mxu0 }
  0x91   :  { %v94_v20 = vadd.f32 %v386_v18, %v93_v19 }
  0x93   :  { %v98_v21 = vmul.f32 0.01, %v94_v20  ;;  %vm97_vm1 = vcmp.gt.f32.partialorder %v94_v20, 0.0 }
  0x95   :  { %v99_v22 = vsel %vm97_vm1, %v94_v20, %v98_v21 }
  0x96   :  { %v100_v23 = vpack.c.bf16 %v99_v22, %v99_v22 }
  0x98   :  { %v95_v24 = vpop.f32.mrf.mxu0  ;;  %177 = vmatmul.bf16.vlgmr.msra.gmra.mxu1 %v100_v23 }
 0x115   :  { %v178_v28 = vpop.f32.mrf.mxu1 }
 0x116   :  { %v179_v29 = vadd.f32 %v387_v27, %v178_v28 }
 0x118   :  { %v183_v30 = vmul.f32 0.01, %v179_v29  ;;  %vm182_vm2 = vcmp.gt.f32.partialorder %v179_v29, 0.0 }
 0x11a   :  { %v184_v31 = vsel %vm182_vm2, %v179_v29, %v183_v30 }
 0x11b   :  { %v185_v32 = vpack.c.bf16 %v184_v31, %v184_v31 }
 0x11d   :  { %v180_v33 = vpop.f32.mrf.mxu1  ;;  %262 = vmatmul.bf16.vlgmr.msra.gmra.mxu2 %v185_v32 }
 0x1a0   :  { %v263_v35 = vpop.f32.mrf.mxu2 }
 0x1a1   :  { %v264_v36 = vadd.f32 %v388_v34, %v263_v35 }
 0x1a3   :  { %vm267_vm3 = vcmp.gt.f32.partialorder %v264_v36, 0.0  ;;  %v268_v37 = vmul.f32 0.01, %v264_v36 }
 0x1a5   :  { %v269_v38 = vsel %vm267_vm3, %v264_v36, %v268_v37 }
 0x1a6   :  { %271 = vst.msk [vmem:[#allocation7] sm:$0xff] %vm270_vm4, %v269_v38 }
 0x1a7   :  { %282 = dma.vmem_to_hbm [thread:$0]  %s278_s22, 128, %s280_s4, [#allocation4]  }
 0x1a8   :  { %v265_v39 = vpop.f32.mrf.mxu2 }
 0x1a9   :  { %465 = dma.done.wait [#allocation4], 128  }
 0x1aa   :  { %466 = vsyncadd [#allocation4], 4294967168 }
 0x1ab   :  { %287 = vsyncpa [#allocation3], 1 }
 0x1ac   :  { %288 = vsyncpa [#allocation6], 1 }
 0x1ad   :  { %289 = vsyncpa [#allocation4], 1 }

</bundles_post_ra>
